<compile_context>
chip_gen: v7x
topology: tpu7x:2x2x1
jax: 0.10.0
libtpu: 0.0.40
codegen_flags: <defaults>
</compile_context>

<pallas_src>
import jax
import jax.numpy as jnp
from jax.experimental import pallas as pl
from jax.experimental.pallas import tpu as pltpu


def transformer1_kernel(
    p_ref, enc_ref, g_ref, l_ref,      # batch-blocked activations
    wx_ref, wp_ref, bcat_ref,          # fused dense_1 / fc_p: [192,32],[3,32],[1,32]
    wl_ref, bl_ref,                    # l: Linear(116 -> 32)
    w2_ref, b2_ref,                    # dense_2: [32,2], [1,2]
    out_ref,
):
    f32 = jnp.float32

    # cat([dense_1(enc), fc_p(p)], dim=1) computed directly as one 32-lane
    # result: dense_1's weights live in output cols 0:16 of wx, fc_p's in
    # cols 16:32 of wp (zeros elsewhere), so no lane-axis concatenate is
    # needed in the kernel.
    cat = (jnp.dot(enc_ref[...], wx_ref[...], preferred_element_type=f32)
           + jnp.dot(p_ref[...], wp_ref[...], preferred_element_type=f32)
           + bcat_ref[...])

    # l.sum(dim=1), done in-kernel on the untouched [TB, S, 116] block
    # (sublane-axis reduction; no wrapper-side relayout of `l`).
    l_sum = jnp.sum(l_ref[...], axis=1)
    ll = jnp.dot(l_sum, wl_ref[...], preferred_element_type=f32) + bl_ref[...]

    g = g_ref[...]
    f_o = g * cat + (1.0 - g) * ll
    out_ref[...] = (jnp.dot(f_o, w2_ref[...], preferred_element_type=f32)
                    + b2_ref[...])


def _round_up(x, m):
    return ((x + m - 1) // m) * m


def _choose_tb(B, S):
    """Batch tile size: biggest tile under a conservative VMEM budget,
    S-aware, and capped so the grid has >= 2 steps when B allows (v7x)."""
    # VMEM-tile-padded bytes per batch row (f32): p 3->128 lanes,
    # enc 192->256, g 32->128, l S->round_up(S,8) sublanes x 128 lanes,
    # out 2->128.
    row_bytes = 4 * (128 + 256 + 128 + _round_up(S, 8) * 128 + 128)
    vmem_budget = 12 << 20                 # double-buffered inputs; safe under
    tb = vmem_budget // (2 * row_bytes)    # v5e's 16 MiB default scoped VMEM.
    tb = max(8, min(2048, (tb // 8) * 8))
    if B > 8:
        # Keep >= 2 grid steps so dimension_semantics=("parallel",) can shard
        # the batch axis across both TensorCores on v7x.
        tb = min(tb, max(8, _round_up((B + 1) // 2, 8)))
    if tb >= B:
        tb = B                             # single full block (any B is legal)
    return tb


def transformer1_forward(p, enc_inputs, g, f, l, params, tb=None):
    # `f` is unused, matching the PyTorch forward.
    del f
    B = enc_inputs.shape[0]
    S = l.shape[1]
    TB = _choose_tb(B, S) if tb is None else tb
    grid = (pl.cdiv(B, TB),)    # partial trailing block handled by Pallas

    batch2 = lambda i: (i, 0)
    batch3 = lambda i: (i, 0, 0)
    const = lambda i: (0, 0)    # weights/biases stay VMEM-resident

    in_specs = [
        pl.BlockSpec((TB, 3), batch2),
        pl.BlockSpec((TB, 192), batch2),
        pl.BlockSpec((TB, 32), batch2),
        pl.BlockSpec((TB, S, 116), batch3),
        pl.BlockSpec((192, 32), const),
        pl.BlockSpec((3, 32), const),
        pl.BlockSpec((1, 32), const),
        pl.BlockSpec((116, 32), const),
        pl.BlockSpec((1, 32), const),
        pl.BlockSpec((32, 2), const),
        pl.BlockSpec((1, 2), const),
    ]
    out_spec = pl.BlockSpec((TB, 2), batch2)

    return pl.pallas_call(
        transformer1_kernel,
        out_shape=jax.ShapeDtypeStruct((B, 2), jnp.float32),
        grid=grid,
        in_specs=in_specs,
        out_specs=out_spec,
        compiler_params=pltpu.CompilerParams(
            dimension_semantics=("parallel",)),
    )(p, enc_inputs, g, l,
      params["wx32"], params["wp32"], params["bcat"],
      params["wl"], params["bl"],
      params["w2"], params["b2"])


def init_linear(key, in_features, out_features):
    # Deterministic init mimicking nn.Linear default: U(-1/sqrt(in), 1/sqrt(in)).
    kw, kb = jax.random.split(key)
    bound = 1.0 / jnp.sqrt(jnp.float32(in_features))
    # Stored as [in, out] (transposed vs PyTorch's [out, in]) for x @ W.
    w = jax.random.uniform(kw, (in_features, out_features), jnp.float32,
                           minval=-bound, maxval=bound)
    b = jax.random.uniform(kb, (1, out_features), jnp.float32,
                           minval=-bound, maxval=bound)
    return w, b


def make_params(key):
    k1, k2, k3, k4 = jax.random.split(key, 4)
    w1, b1 = init_linear(k1, 192, 16)   # dense_1
    wp, bp = init_linear(k2, 3, 16)     # fc_p
    wl, bl = init_linear(k3, 116, 32)   # l
    w2, b2 = init_linear(k4, 32, 2)     # dense_2

    # Fused kernel-side forms (constant folding at param time):
    #   wx32: dense_1 weights in output cols 0:16, cols 16:32 zero.
    #   wp32: fc_p weights in output cols 16:32, cols 0:16 zero.
    #   bcat: concat(b1, bp) -> [1, 32].
    wx32 = jnp.concatenate([w1, jnp.zeros((192, 16), jnp.float32)], axis=1)
    wp32 = jnp.concatenate([jnp.zeros((3, 16), jnp.float32), wp], axis=1)
    bcat = jnp.concatenate([b1, bp], axis=1)

    return dict(w1=w1, b1=b1, wp=wp, bp=bp, wl=wl, bl=bl, w2=w2, b2=b2,
                wx32=wx32, wp32=wp32, bcat=bcat)


def reference_forward(p, enc_inputs, g, f, l, params):
    del f
    x = enc_inputs @ params["w1"] + params["b1"]
    pp = p @ params["wp"] + params["bp"]
    ls = l.sum(axis=1) @ params["wl"] + params["bl"]
    f_o = g * jnp.concatenate([x, pp], axis=1) + (1.0 - g) * ls
    return f_o @ params["w2"] + params["b2"]


def _make_inputs(key, B, S):
    kp, kenc, kg, kf, kl = jax.random.split(key, 5)
    p = jax.random.normal(kp, (B, 3), jnp.float32)
    enc_inputs = jax.random.normal(kenc, (B, 192), jnp.float32)
    g = jax.random.uniform(kg, (B, 32), jnp.float32)          # gate in [0, 1)
    f = jax.random.normal(kf, (B, 16), jnp.float32)           # unused by forward
    l = jax.random.normal(kl, (B, S, 116), jnp.float32)
    return p, enc_inputs, g, f, l


if __name__ == "__main__":
    key = jax.random.PRNGKey(0)
    kparam, kin1, kin2 = jax.random.split(key, 3)
    params = make_params(kparam)

    # Small single-block check (TB == B, grid=(1,)).
    B, S = 8, 4
    p, enc_inputs, g, f, l = _make_inputs(kin1, B, S)
    out = jax.block_until_ready(
        transformer1_forward(p, enc_inputs, g, f, l, params))
    ref = reference_forward(p, enc_inputs, g, f, l, params)
    assert out.shape == (B, 2), out.shape
    assert jnp.allclose(out, ref, atol=1e-4, rtol=1e-4), (
        float(jnp.max(jnp.abs(out - ref))))

    # Multi-step grid + partial trailing block (B=20 -> TB=16, blocks of 16
    # and 4 rows), exercising the pipelined batch-tiled path with no
    # wrapper-side padding copies.
    B2, S2 = 20, 4
    p2, enc2, g2, f2, l2 = _make_inputs(kin2, B2, S2)
    out2 = jax.block_until_ready(
        transformer1_forward(p2, enc2, g2, f2, l2, params))
    ref2 = reference_forward(p2, enc2, g2, f2, l2, params)
    assert out2.shape == (B2, 2), out2.shape
    assert jnp.allclose(out2, ref2, atol=1e-4, rtol=1e-4), (
        float(jnp.max(jnp.abs(out2 - ref2))))

    print("KERNEL_OK")
</pallas_src>

<mosaic_0001>
module attributes {stable_mosaic.version = 11 : i64} {
  func.func @transformer1_kernel(%arg0: i32, %arg1: memref<8x3xf32, #tpu.memory_space<vmem>>, %arg2: memref<8x192xf32, #tpu.memory_space<vmem>>, %arg3: memref<8x32xf32, #tpu.memory_space<vmem>>, %arg4: memref<8x4x116xf32, #tpu.memory_space<vmem>>, %arg5: memref<192x32xf32, #tpu.memory_space<vmem>>, %arg6: memref<3x32xf32, #tpu.memory_space<vmem>>, %arg7: memref<1x32xf32, #tpu.memory_space<vmem>>, %arg8: memref<116x32xf32, #tpu.memory_space<vmem>>, %arg9: memref<1x32xf32, #tpu.memory_space<vmem>>, %arg10: memref<32x2xf32, #tpu.memory_space<vmem>>, %arg11: memref<1x2xf32, #tpu.memory_space<vmem>>, %arg12: memref<8x2xf32, #tpu.memory_space<vmem>>) attributes {dimension_semantics = [#tpu.dimension_semantics<parallel>], iteration_bounds = array<i64: 1>, scalar_prefetch = 0 : i64, scratch_operands = 0 : i64, tpu.core_type = #tpu.core_type<tc>, window_params = [{transform_indices = @transform_0, window_bounds = array<i64: 8, 3>}, {transform_indices = @transform_1, window_bounds = array<i64: 8, 192>}, {transform_indices = @transform_2, window_bounds = array<i64: 8, 32>}, {transform_indices = @transform_3, window_bounds = array<i64: 8, 4, 116>}, {pipeline_mode = #tpu.pipeline_mode<synchronous>, transform_indices = @transform_4, window_bounds = array<i64: 192, 32>}, {pipeline_mode = #tpu.pipeline_mode<synchronous>, transform_indices = @transform_5, window_bounds = array<i64: 3, 32>}, {pipeline_mode = #tpu.pipeline_mode<synchronous>, transform_indices = @transform_6, window_bounds = array<i64: 1, 32>}, {pipeline_mode = #tpu.pipeline_mode<synchronous>, transform_indices = @transform_7, window_bounds = array<i64: 116, 32>}, {pipeline_mode = #tpu.pipeline_mode<synchronous>, transform_indices = @transform_8, window_bounds = array<i64: 1, 32>}, {pipeline_mode = #tpu.pipeline_mode<synchronous>, transform_indices = @transform_9, window_bounds = array<i64: 32, 2>}, {pipeline_mode = #tpu.pipeline_mode<synchronous>, transform_indices = @transform_10, window_bounds = array<i64: 1, 2>}, {transform_indices = @transform_11, window_bounds = array<i64: 8, 2>}]} {
    %c0 = arith.constant 0 : index
    %c0_0 = arith.constant 0 : index
    %0 = vector.load %arg2[%c0, %c0_0] : memref<8x192xf32, #tpu.memory_space<vmem>>, vector<8x192xf32>
    %c0_1 = arith.constant 0 : index
    %c0_2 = arith.constant 0 : index
    %1 = vector.load %arg5[%c0_1, %c0_2] : memref<192x32xf32, #tpu.memory_space<vmem>>, vector<192x32xf32>
    %cst = arith.constant dense<0.000000e+00> : vector<8x32xf32>
    %2 = tpu.matmul %0, %1, %cst {dimension_numbers = #tpu.dot_dimension_numbers<[1], [0], [0], [1], [0, 0, 1, 1], [], []>} : vector<8x192xf32>, vector<192x32xf32>, vector<8x32xf32> -> vector<8x32xf32>
    %c0_3 = arith.constant 0 : index
    %c0_4 = arith.constant 0 : index
    %3 = vector.load %arg1[%c0_3, %c0_4] : memref<8x3xf32, #tpu.memory_space<vmem>>, vector<8x3xf32>
    %c0_5 = arith.constant 0 : index
    %c0_6 = arith.constant 0 : index
    %4 = vector.load %arg6[%c0_5, %c0_6] : memref<3x32xf32, #tpu.memory_space<vmem>>, vector<3x32xf32>
    %cst_7 = arith.constant dense<0.000000e+00> : vector<8x32xf32>
    %5 = tpu.matmul %3, %4, %cst_7 {dimension_numbers = #tpu.dot_dimension_numbers<[1], [0], [0], [1], [0, 0, 1, 1], [], []>} : vector<8x3xf32>, vector<3x32xf32>, vector<8x32xf32> -> vector<8x32xf32>
    %6 = arith.addf %2, %5 : vector<8x32xf32>
    %c0_8 = arith.constant 0 : index
    %c0_9 = arith.constant 0 : index
    %7 = vector.load %arg7[%c0_8, %c0_9] : memref<1x32xf32, #tpu.memory_space<vmem>>, vector<1x32xf32>
    %8 = vector.broadcast %7 : vector<1x32xf32> to vector<8x32xf32>
    %9 = arith.addf %6, %8 : vector<8x32xf32>
    %c0_10 = arith.constant 0 : index
    %c0_11 = arith.constant 0 : index
    %c0_12 = arith.constant 0 : index
    %10 = vector.load %arg4[%c0_10, %c0_11, %c0_12] : memref<8x4x116xf32, #tpu.memory_space<vmem>>, vector<8x4x116xf32>
    %cst_13 = arith.constant dense<0.000000e+00> : vector<8x116xf32>
    %11 = vector.multi_reduction <add>, %10, %cst_13 [1] : vector<8x4x116xf32> to vector<8x116xf32>
    %c0_14 = arith.constant 0 : index
    %c0_15 = arith.constant 0 : index
    %12 = vector.load %arg8[%c0_14, %c0_15] : memref<116x32xf32, #tpu.memory_space<vmem>>, vector<116x32xf32>
    %cst_16 = arith.constant dense<0.000000e+00> : vector<8x32xf32>
    %13 = tpu.matmul %11, %12, %cst_16 {dimension_numbers = #tpu.dot_dimension_numbers<[1], [0], [0], [1], [0, 0, 1, 1], [], []>} : vector<8x116xf32>, vector<116x32xf32>, vector<8x32xf32> -> vector<8x32xf32>
    %c0_17 = arith.constant 0 : index
    %c0_18 = arith.constant 0 : index
    %14 = vector.load %arg9[%c0_17, %c0_18] : memref<1x32xf32, #tpu.memory_space<vmem>>, vector<1x32xf32>
    %15 = vector.broadcast %14 : vector<1x32xf32> to vector<8x32xf32>
    %16 = arith.addf %13, %15 : vector<8x32xf32>
    %c0_19 = arith.constant 0 : index
    %c0_20 = arith.constant 0 : index
    %17 = vector.load %arg3[%c0_19, %c0_20] : memref<8x32xf32, #tpu.memory_space<vmem>>, vector<8x32xf32>
    %18 = arith.mulf %17, %9 : vector<8x32xf32>
    %cst_21 = arith.constant 1.000000e+00 : f32
    %19 = vector.broadcast %cst_21 : f32 to vector<8x32xf32>
    %20 = arith.subf %19, %17 : vector<8x32xf32>
    %21 = arith.mulf %20, %16 : vector<8x32xf32>
    %22 = arith.addf %18, %21 : vector<8x32xf32>
    %c0_22 = arith.constant 0 : index
    %c0_23 = arith.constant 0 : index
    %23 = vector.load %arg10[%c0_22, %c0_23] : memref<32x2xf32, #tpu.memory_space<vmem>>, vector<32x2xf32>
    %cst_24 = arith.constant dense<0.000000e+00> : vector<8x2xf32>
    %24 = tpu.matmul %22, %23, %cst_24 {dimension_numbers = #tpu.dot_dimension_numbers<[1], [0], [0], [1], [0, 0, 1, 1], [], []>} : vector<8x32xf32>, vector<32x2xf32>, vector<8x2xf32> -> vector<8x2xf32>
    %c0_25 = arith.constant 0 : index
    %c0_26 = arith.constant 0 : index
    %25 = vector.load %arg11[%c0_25, %c0_26] : memref<1x2xf32, #tpu.memory_space<vmem>>, vector<1x2xf32>
    %26 = vector.broadcast %25 : vector<1x2xf32> to vector<8x2xf32>
    %27 = arith.addf %24, %26 : vector<8x2xf32>
    %c0_27 = arith.constant 0 : index
    %c0_28 = arith.constant 0 : index
    %28 = vector.load %arg12[%c0_27, %c0_28] : memref<8x2xf32, #tpu.memory_space<vmem>>, vector<8x2xf32>
    tpu.vector_store %arg12[%c0_27, %c0_28], %27 {strides = array<i32>} : memref<8x2xf32, #tpu.memory_space<vmem>>, vector<8x2xf32>,
    return
  }
  func.func @transform_0(%arg0: i32) -> (i32, i32) {
    %c0_i32 = arith.constant 0 : i32
    %c0_i32_0 = arith.constant 0 : i32
    return %arg0, %c0_i32 : i32, i32
  }
  func.func @transform_1(%arg0: i32) -> (i32, i32) {
    %c0_i32 = arith.constant 0 : i32
    %c0_i32_0 = arith.constant 0 : i32
    return %arg0, %c0_i32 : i32, i32
  }
  func.func @transform_2(%arg0: i32) -> (i32, i32) {
    %c0_i32 = arith.constant 0 : i32
    %c0_i32_0 = arith.constant 0 : i32
    return %arg0, %c0_i32 : i32, i32
  }
  func.func @transform_3(%arg0: i32) -> (i32, i32, i32) {
    %c0_i32 = arith.constant 0 : i32
    %c0_i32_0 = arith.constant 0 : i32
    %c0_i32_1 = arith.constant 0 : i32
    return %arg0, %c0_i32, %c0_i32_0 : i32, i32, i32
  }
  func.func @transform_4(%arg0: i32) -> (i32, i32) {
    %c0_i32 = arith.constant 0 : i32
    %c0_i32_0 = arith.constant 0 : i32
    %c0_i32_1 = arith.constant 0 : i32
    return %c0_i32, %c0_i32_0 : i32, i32
  }
  func.func @transform_5(%arg0: i32) -> (i32, i32) {
    %c0_i32 = arith.constant 0 : i32
    %c0_i32_0 = arith.constant 0 : i32
    %c0_i32_1 = arith.constant 0 : i32
    return %c0_i32, %c0_i32_0 : i32, i32
  }
  func.func @transform_6(%arg0: i32) -> (i32, i32) {
    %c0_i32 = arith.constant 0 : i32
    %c0_i32_0 = arith.constant 0 : i32
    %c0_i32_1 = arith.constant 0 : i32
    return %c0_i32, %c0_i32_0 : i32, i32
  }
  func.func @transform_7(%arg0: i32) -> (i32, i32) {
    %c0_i32 = arith.constant 0 : i32
    %c0_i32_0 = arith.constant 0 : i32
    %c0_i32_1 = arith.constant 0 : i32
    return %c0_i32, %c0_i32_0 : i32, i32
  }
  func.func @transform_8(%arg0: i32) -> (i32, i32) {
    %c0_i32 = arith.constant 0 : i32
    %c0_i32_0 = arith.constant 0 : i32
    %c0_i32_1 = arith.constant 0 : i32
    return %c0_i32, %c0_i32_0 : i32, i32
  }
  func.func @transform_9(%arg0: i32) -> (i32, i32) {
    %c0_i32 = arith.constant 0 : i32
    %c0_i32_0 = arith.constant 0 : i32
    %c0_i32_1 = arith.constant 0 : i32
    return %c0_i32, %c0_i32_0 : i32, i32
  }
  func.func @transform_10(%arg0: i32) -> (i32, i32) {
    %c0_i32 = arith.constant 0 : i32
    %c0_i32_0 = arith.constant 0 : i32
    %c0_i32_1 = arith.constant 0 : i32
    return %c0_i32, %c0_i32_0 : i32, i32
  }
  func.func @transform_11(%arg0: i32) -> (i32, i32) {
    %c0_i32 = arith.constant 0 : i32
    %c0_i32_0 = arith.constant 0 : i32
    return %arg0, %c0_i32 : i32, i32
  }
}

</mosaic_0001>

<bundles_post_ra>
// kernel: tpu_custom_call.1
= control target key start
LH: loop header
LB: loop body
LE: loop exit
PB: predicated region body
PF: predicated region fallthrough
CT: control target
= control target key end

     0   :  { %v655_v0 = vmov 0.0|0.0   ;;  %v656_v4 = vmov 0.0   ;;  %vm70_vm0 = vcmask 1042432   ;;  %vm657_vm1 = vmmov 0   ;;  %s980_s4 = inlined_call_operand.vmem [shape: f32[192,32], index: 4, kind: input, shape index: {}]   ;;  %s981_s5 = inlined_call_operand.vmem [shape: f32[3,32], index: 5, kind: input, shape index: {}]   ;;  %s982_s0 = inlined_call_operand.vmem [shape: f32[8,3], index: 0, kind: input, shape index: {}]   ;;  %s983_s7 = inlined_call_operand.vmem [shape: f32[116,32], index: 7, kind: input, shape index: {}]   ;;  %s984_s1 = inlined_call_operand.vmem [shape: f32[8,192], index: 1, kind: input, shape index: {}]   ;;  %s985_s3 = inlined_call_operand.vmem [shape: f32[8,4,116], index: 3, kind: input, shape index: {}]   ;;  %s986_s9 = inlined_call_operand.vmem [shape: f32[32,2], index: 9, kind: input, shape index: {}]   ;;  %s987_s2 = inlined_call_operand.vmem [shape: f32[8,32], index: 2, kind: input, shape index: {}]   ;;  %s988_s8 = inlined_call_operand.vmem [shape: f32[1,32], index: 8, kind: input, shape index: {}]   ;;  %s989_s6 = inlined_call_operand.vmem [shape: f32[1,32], index: 6, kind: input, shape index: {}]   ;;  %s990_s10 = inlined_call_operand.vmem [shape: f32[1,2], index: 10, kind: input, shape index: {}]   ;;  %s991_s11 = inlined_call_operand.vmem [shape: f32[8,2], index: 11, kind: output, shape index: {}]  }
   0x1   :  { %589 = vmatprep.subr.bf16.mxu1 %v655_v0  ;;  %v40_v1 = vld [vmem:[%s980_s4] sm:$0xff]  ;;  %v41_v2 = vld [vmem:[%s980_s4 + $0x8] sm:$0xff]  ;;  %v42_v3 = vld [vmem:[%s980_s4 + $0x10] sm:$0xff]  ;;  %540 = vmatprep.subr.mxu0 %v656_v4  ;;  %vm66_vm2 = vcmask 23552   ;;  %vm144_vm3 = vcmask 523264   ;;  %vm234_vm4 = vcmask 945152  }
   0x2   :  { %v590_v5 = vpack.c.bf16 %v41_v2, %v40_v1  ;;  %v43_v6 = vld [vmem:[%s980_s4 + $0x18] sm:$0xff]  ;;  %542 = vmatprep.mubr.msk.f32.mxu0 %vm657_vm1, %v656_v4  ;;  %v44_v8 = vld [vmem:[%s980_s4 + $0x20] sm:$0xff]  ;;  %v45_v11 = vld [vmem:[%s980_s4 + $0x28] sm:$0xff]  ;;  %vm321_vm5 = vcmask 1041409   ;;  %vm323_vm6 = vcmask 1042434   ;;  %vm325_vm7 = vcmask 1043459  }
   0x3   :  { %v593_v7 = vpack.c.bf16 %v43_v6, %v42_v3  ;;  %v65_v9 = vld [vmem:[%s981_s5] sm:$0x7]  ;;  %v292_v13 = vld [vmem:[%s983_s7 + $0x8] sm:$0xff]  ;;  %v293_v15 = vld [vmem:[%s983_s7 + $0x10] sm:$0xff]  ;;  %v596_v17 = vpack.c.bf16 %v45_v11, %v44_v8  ;;  %vm327_vm8 = vcmask 1044484   ;;  %vm338_vm9 = vcmask 1043456  }
   0x4   :  { %591 = vmatpush1.bf16.msra.mxu1 %v590_v5  ;;  %v64_v10 = vld [vmem:[%s982_s0] sm:$0xff]  ;;  %541 = vmatpush3.msk.msra.mxu0 %vm70_vm0, %v65_v9  ;;  %v294_v16 = vld [vmem:[%s983_s7 + $0x18] sm:$0xff]  ;;  %v46_v18 = vld [vmem:[%s980_s4 + $0x30] sm:$0xff]  ;;  %vm329_vm10 = vcmask 1045509   ;;  %vm331_vm11 = vcmask 1046534   ;;  %vm333_vm12 = vcmask 1047559  }
   0x5   :  { %592 = vmatprep.subr.bf16.mxu1 %v655_v0  ;;  %v291_v12 = vld [vmem:[%s983_s7] sm:$0xff]  ;;  %625 = vmatprep.subr.bf16.mxu0 %v655_v0  ;;  %v629_v19 = vpack.c.bf16 %v294_v16, %v293_v15  ;;  %v47_v20 = vld [vmem:[%s980_s4 + $0x38] sm:$0xff]  ;;  %v296_v22 = vld [vmem:[%s983_s7 + $0x28] sm:$0xff]  ;;  %vm335_vm13 = vcmask 949248   ;;  %vm428_vm14 = vcmask 261120   ;;  %vm502_vm15 = vcmask 15360  }
   0x6   :  { %543 = vmatmul.mubr.msk.f32.vlgmr.msra.gmra.mrb[0].mxu0 %vm66_vm2, %v64_v10  ;;  %v626_v14 = vpack.c.bf16 %v292_v13, %v291_v12  ;;  %v295_v21 = vld [vmem:[%s983_s7 + $0x20] sm:$0xff]  ;;  %v49_v24 = vld [vmem:[%s980_s4 + $0x48] sm:$0xff]  ;;  %v785_v25 = vld [vmem:[%s980_s4 + $0x50] sm:$0xff]  ;;  %v599_v31 = vpack.c.bf16 %v47_v20, %v46_v18 }
   0x7   :  { %575 = vmatprep.mubr.msk.f32.mxu0 %vm657_vm1, %v656_v4  ;;  %v48_v23 = vld [vmem:[%s980_s4 + $0x40] sm:$0xff]  ;;  %v790_v26 = vld [vmem:[%s980_s4 + $0x58] sm:$0xff]  ;;  %v800_v28 = vld [vmem:[%s980_s4 + $0x68] sm:$0xff]  ;;  %v632_v32 = vpack.c.bf16 %v296_v22, %v295_v21 }
   0x8   :  { %594 = vmatpush1.bf16.msra.mxu1 %v593_v7  ;;  %627 = vmatpush3.bf16.msra.mxu0 %v626_v14  ;;  %v795_v27 = vld [vmem:[%s980_s4 + $0x60] sm:$0xff]  ;;  %v805_v29 = vld [vmem:[%s980_s4 + $0x70] sm:$0xff]  ;;  %v810_v30 = vld [vmem:[%s980_s4 + $0x78] sm:$0xff]  ;;  %v602_v42 = vpack.c.bf16 %v49_v24, %v48_v23  ;;  %v605_v43 = vpack.c.bf16 %v790_v26, %v785_v25 }
   0x9   :  { %595 = vmatprep.subr.bf16.mxu1 %v655_v0  ;;  %628 = vmatprep.subr.bf16.mxu0 %v655_v0  ;;  %v297_v33 = vld [vmem:[%s983_s7 + $0x30] sm:$0xff]  ;;  %v298_v34 = vld [vmem:[%s983_s7 + $0x38] sm:$0xff]  ;;  %v821_v35 = vld [vmem:[%s983_s7 + $0x40] sm:$0xff]  ;;  %v608_v46 = vpack.c.bf16 %v800_v28, %v795_v27  ;;  %v611_v47 = vpack.c.bf16 %v810_v30, %v805_v29 }
   0xa   :  { %v300_v36 = vld [vmem:[%s983_s7 + $0x48] sm:$0xff]  ;;  %v831_v37 = vld [vmem:[%s983_s7 + $0x50] sm:$0xff]  ;;  %v836_v38 = vld [vmem:[%s983_s7 + $0x58] sm:$0xff]  ;;  %v635_v48 = vpack.c.bf16 %v298_v34, %v297_v33 }
   0xb   :  { %v841_v39 = vld [vmem:[%s983_s7 + $0x60] sm:$0xff]  ;;  %v846_v40 = vld [vmem:[%s983_s7 + $0x68] sm:$0xff]  ;;  %v230_v51 = vld [vmem:[%s985_s3 + $0x10] sm:$0xf]  ;;  %v638_v52 = vpack.c.bf16 %v300_v36, %v821_v35  ;;  %v641_v53 = vpack.c.bf16 %v836_v38, %v831_v37 }
   0xc   :  { %597 = vmatpush1.bf16.msra.mxu1 %v596_v17  ;;  %630 = vmatpush3.bf16.msra.mxu0 %v629_v19  ;;  %v39_v41 = vld [vmem:[%s984_s1 + $0x8] sm:$0xff]  ;;  %v226_v44 = vld [vmem:[%s985_s3] sm:$0xf]  ;;  %v227_v45 = vld [vmem:[%s985_s3 + $0x4] sm:$0xf]  ;;  %v644_v54 = vpack.c.bf16 %v846_v40, %v841_v39  ;;  %v263_v3 = vsel %vm234_vm4, %v230_v51, 0.0 }
   0xd   :  { %598 = vmatprep.subr.bf16.mxu1 %v655_v0  ;;  %631 = vmatprep.subr.bf16.mxu0 %v655_v0  ;;  %v228_v49 = vld [vmem:[%s985_s3 + $0x8] sm:$0xf]  ;;  %v229_v50 = vld [vmem:[%s985_s3 + $0xc] sm:$0xf]  ;;  %v231_v55 = vld [vmem:[%s985_s3 + $0x14] sm:$0xf] }
   0xe   :  { %510 = vmatprep.mubr.msk.f32.mxu1 %vm144_vm3, %v39_v41  ;;  %v232_v56 = vld [vmem:[%s985_s3 + $0x18] sm:$0xf]  ;;  %v233_v57 = vld [vmem:[%s985_s3 + $0x1c] sm:$0xf]  ;;  %v235_v58 = vsel %vm234_vm4, %v226_v44, 0.0  ;;  %v242_v59 = vsel %vm234_vm4, %v227_v45, 0.0 }
   0xf   :  { %v249_v60 = vsel %vm234_vm4, %v228_v49, 0.0  ;;  %v256_v61 = vsel %vm234_vm4, %v229_v50, 0.0  ;;  %v236_v62 = vrot.slane %v235_v58, 4  ;;  %v243_v63 = vrot.slane %v242_v59, 4  ;;  %v57_v49 = vld [vmem:[%s980_s4 + $0x88] sm:$0xff] }
  0x10   :  { %600 = vmatpush1.bf16.msra.mxu1 %v599_v31  ;;  %633 = vmatpush3.bf16.msra.mxu0 %v632_v32  ;;  %v250_v1 = vrot.slane %v249_v60, 4  ;;  %v257_v2 = vrot.slane %v256_v61, 4  ;;  %v270_v5 = vsel %vm234_vm4, %v231_v55, 0.0  ;;  %v277_v6 = vsel %vm234_vm4, %v232_v56, 0.0  ;;  %v305_v29 = vld [vmem:[%s983_s7 + $0x70] sm:$0xf] }
  0x11   :  { %601 = vmatprep.subr.bf16.mxu1 %v655_v0  ;;  %634 = vmatprep.subr.bf16.mxu0 %v655_v0  ;;  %v284_v7 = vsel %vm234_vm4, %v233_v57, 0.0  ;;  %v237_v8 = vadd.f32 %v236_v62, %v235_v58  ;;  %v244_v9 = vadd.f32 %v243_v63, %v242_v59  ;;  %v264_v11 = vrot.slane %v263_v3, 4 }
  0x12   :  { %v251_v10 = vadd.f32 %v250_v1, %v249_v60  ;;  %v258_v12 = vadd.f32 %v257_v2, %v256_v61  ;;  %v271_v13 = vrot.slane %v270_v5, 4  ;;  %v278_v14 = vrot.slane %v277_v6, 4  ;;  %v58_v60 = vld [vmem:[%s980_s4 + $0x90] sm:$0xff]  ;;  %v59_v61 = vld [vmem:[%s980_s4 + $0x98] sm:$0xff]  ;;  %v60_v1 = vld [vmem:[%s980_s4 + $0xa0] sm:$0xff] }
  0x13   :  { %v285_v15 = vrot.slane %v284_v7, 4  ;;  %v238_v16 = vrot.slane %v237_v8, 2  ;;  %v245_v17 = vrot.slane %v244_v9, 2  ;;  %v265_v19 = vadd.f32 %v264_v11, %v263_v3  ;;  %v61_v2 = vld [vmem:[%s980_s4 + $0xa8] sm:$0xff] }
  0x14   :  { %603 = vmatpush1.bf16.msra.mxu1 %v602_v42  ;;  %636 = vmatpush3.bf16.msra.mxu0 %v635_v48  ;;  %v252_v18 = vrot.slane %v251_v10, 2  ;;  %v259_v20 = vrot.slane %v258_v12, 2  ;;  %v272_v21 = vadd.f32 %v271_v13, %v270_v5  ;;  %v279_v22 = vadd.f32 %v278_v14, %v277_v6  ;;  %v56_v48 = vld [vmem:[%s980_s4 + $0x80] sm:$0xff]  ;;  %v418_v11 = vld [vmem:[%s986_s9 + $0x8] sm:$0xff]  ;;  %v419_v13 = vld [vmem:[%s986_s9 + $0x10] sm:$0xff] }
  0x15   :  { %604 = vmatprep.subr.bf16.mxu1 %v655_v0  ;;  %637 = vmatprep.subr.bf16.mxu0 %v655_v0  ;;  %v286_v23 = vadd.f32 %v285_v15, %v284_v7  ;;  %v239_v24 = vadd.f32 %v238_v16, %v237_v8  ;;  %v246_v25 = vadd.f32 %v245_v17, %v244_v9  ;;  %v266_v31 = vrot.slane %v265_v19, 2  ;;  %v62_v7 = vld [vmem:[%s980_s4 + $0xb0] sm:$0xff]  ;;  %v63_v8 = vld [vmem:[%s980_s4 + $0xb8] sm:$0xff] }
  0x16   :  { %v253_v26 = vadd.f32 %v252_v18, %v251_v10  ;;  %v260_v32 = vadd.f32 %v259_v20, %v258_v12  ;;  %v273_v33 = vrot.slane %v272_v21, 2  ;;  %v280_v34 = vrot.slane %v279_v22, 2  ;;  %v38_v10 = vld [vmem:[%s984_s1] sm:$0xff]  ;;  %v420_v14 = vld [vmem:[%s986_s9 + $0x18] sm:$0xff] }
  0x17   :  { %v287_v35 = vrot.slane %v286_v23, 2  ;;  %v240_v36 = vrot.slane %v239_v24, 1  ;;  %v247_v37 = vrot.slane %v246_v25, 1  ;;  %v267_v41 = vadd.f32 %v266_v31, %v265_v19  ;;  %v412_v20 = vld [vmem:[%s987_s2] sm:$0xff] }
  0x18   :  { %606 = vmatpush1.bf16.msra.mxu1 %v605_v43  ;;  %639 = vmatpush3.bf16.msra.mxu0 %v638_v52  ;;  %v254_v38 = vrot.slane %v253_v26, 1  ;;  %v261_v42 = vrot.slane %v260_v32, 1  ;;  %v274_v43 = vadd.f32 %v273_v33, %v272_v21  ;;  %v281_v44 = vadd.f32 %v280_v34, %v279_v22 }
  0x19   :  { %607 = vmatprep.subr.bf16.mxu1 %v655_v0  ;;  %640 = vmatprep.subr.bf16.mxu0 %v655_v0  ;;  %v288_v45 = vadd.f32 %v287_v35, %v286_v23  ;;  %v241_v50 = vadd.f32 %v240_v36, %v239_v24  ;;  %v248_v27 = vadd.f32 %v247_v37, %v246_v25  ;;  %v414_v22 = vsub.f32 1.0, %v412_v20  ;;  %v511_v24 = vld [vmem:[%s989_s6] ss:$0 sm:$0xff] }
  0x1a   :  { %v255_v28 = vadd.f32 %v254_v38, %v253_v26  ;;  %v262_v51 = vadd.f32 %v261_v42, %v260_v32  ;;  %v275_v52 = vrot.slane %v274_v43, 1  ;;  %v614_v58 = vpack.c.bf16 %v57_v49, %v56_v48  ;;  %v515_v35 = vld [vmem:[%s990_s10] ss:$0 sm:$0xff] }
  0x1b   :  { %v289_v55 = vrot.slane %v288_v45, 1  ;;  %v322_v57 = vsel %vm321_vm5, %v248_v27, %v241_v50  ;;  %v617_v62 = vpack.c.bf16 %v59_v61, %v58_v60  ;;  %v620_v6 = vpack.c.bf16 %v61_v2, %v60_v1 }
  0x1c   :  { %609 = vmatpush1.bf16.msra.mxu1 %v608_v46  ;;  %642 = vmatpush3.bf16.msra.mxu0 %v641_v53  ;;  %v268_v46 = vrot.slane %v267_v41, 1  ;;  %v282_v53 = vrot.slane %v281_v44, 1  ;;  %v276_v59 = vadd.f32 %v275_v52, %v274_v43  ;;  %v324_v39 = vsel %vm323_vm6, %v255_v28, %v322_v57 }
  0x1d   :  { %610 = vmatprep.subr.bf16.mxu1 %v655_v0  ;;  %643 = vmatprep.subr.bf16.mxu0 %v655_v0  ;;  %v290_v40 = vadd.f32 %v289_v55, %v288_v45  ;;  %v623_v9 = vpack.c.bf16 %v63_v8, %v62_v7  ;;  %v650_v15 = vpack.c.bf16 %v420_v14, %v419_v13 }
  0x1e   :  { %v269_v56 = vadd.f32 %v268_v46, %v267_v41  ;;  %v283_v30 = vadd.f32 %v282_v53, %v281_v44 }
  0x20   :  { %612 = vmatpush1.bf16.msra.mxu1 %v611_v47  ;;  %645 = vmatpush3.bf16.msra.mxu0 %v644_v54  ;;  %v326_v47 = vsel %vm325_vm7, %v262_v51, %v324_v39 }
  0x21   :  { %613 = vmatprep.subr.bf16.mxu1 %v655_v0  ;;  %573 = vmatprep.subr.mxu0 %v656_v4  ;;  %v328_v54 = vsel %vm327_vm8, %v269_v56, %v326_v47 }
  0x22   :  { %v330_v63 = vsel %vm329_vm10, %v276_v59, %v328_v54 }
  0x23   :  { %v332_v3 = vsel %vm331_vm11, %v283_v30, %v330_v63 }
  0x24   :  { %615 = vmatpush1.bf16.msra.mxu1 %v614_v58  ;;  %574 = vmatpush3.msk.msra.mxu0 %vm338_vm9, %v305_v29  ;;  %v334_v5 = vsel %vm333_vm12, %v290_v40, %v332_v3 }
  0x25   :  { %616 = vmatprep.subr.bf16.mxu1 %v655_v0  ;;  %646 = vmatprep.subr.bf16.mxu0 %v655_v0 }
  0x26   :  { %576 = vmatmul.mubr.msk.f32.vlgmr.msra.gmra.mrb[2].mxu0 %vm335_vm13, %v334_v5 }
  0x27   :  { %586 = vmatprep.mubr.msk.f32.mxu0 %vm657_vm1, %v656_v4  ;;  %v417_v4 = vld [vmem:[%s986_s9] sm:$0xff] }
  0x28   :  { %618 = vmatpush1.bf16.msra.mxu1 %v617_v62  ;;  %v647_v12 = vpack.c.bf16 %v418_v11, %v417_v4 }
  0x29   :  { %619 = vmatprep.subr.bf16.mxu1 %v655_v0 }
  0x2a   :  { %648 = vmatpush3.bf16.msra.mxu0 %v647_v12 }
  0x2b   :  { %649 = vmatprep.subr.bf16.mxu0 %v655_v0 }
  0x2c   :  { %621 = vmatpush1.bf16.msra.mxu1 %v620_v6 }
  0x2d   :  { %622 = vmatprep.subr.bf16.mxu1 %v655_v0  ;;  %v512_v0 = vld [vmem:[%s988_s8] ss:$0 sm:$0xff] }
  0x2e   :  { %651 = vmatpush3.bf16.msra.mxu0 %v650_v15 }
  0x30   :  { %624 = vmatpush1.bf16.msra.mxu1 %v623_v9 }
  0x33   :  { %213 = vmatmul.mubr.f32.vlgmr.msra.gmra.mrb[0].mxu1 %v38_v10 }
  0xd9   :  { %v140_v16 = vpop.f32.mrb[0].mxu0 }
  0xda   :  { %v544_v17 = vpop.f32.mrb[1].mxu0 }
  0xf9   :  { %v408_v18 = vpop.f32.mrb[2].mxu0 }
  0xfa   :  { %v577_v19 = vpop.f32.mrb[3].mxu0  ;;  %v409_v21 = vadd.f32 %v512_v0, %v408_v18 }
  0xfc   :  { %v415_v32 = vmul.f32 %v414_v22, %v409_v21 }
 0x106   :  { %v214_v23 = vpop.f32.mrb[0].mxu1 }
 0x107   :  { %v215_v25 = vadd.f32 %v214_v23, %v140_v16  ;;  %v216_v26 = vpop.f32.mrb[1].mxu1 }
 0x109   :  { %v225_v31 = vadd.f32 %v511_v24, %v215_v25 }
 0x10b   :  { %v413_v33 = vmul.f32 %v412_v20, %v225_v31 }
 0x10d   :  { %v416_v34 = vadd.f32 %v415_v32, %v413_v33 }
 0x10f   :  { %587 = vmatmul.mubr.msk.f32.vlgmr.msra.gmra.mrb[4].mxu0 %vm428_vm14, %v416_v34 }
 0x1e2   :  { %v498_v36 = vpop.f32.mrb[4].mxu0 }
 0x1e3   :  { %v499_v37 = vadd.f32 %v515_v35, %v498_v36  ;;  %v588_v38 = vpop.f32.mrb[5].mxu0 }
 0x1e5   :  { %503 = vst.msk [vmem:[%s991_s11] sm:$0xff] %vm502_vm15, %v499_v37 }

</bundles_post_ra>
